<compile_context>
chip_gen: v7x
topology: tpu7x:2x2x1
jax: 0.10.0
libtpu: 0.0.40
codegen_flags: <defaults>
</compile_context>

<pallas_src>
import functools

import jax
import jax.numpy as jnp
from jax.experimental import pallas as pl
from jax.experimental.pallas import tpu as pltpu


def convblock_kernel(x_ref, masks_ref, w12_ref, b1_ref, b2_ref, w3_ref, b3_ref,
                     o_ref, col_ref, hn_ref, *, H, W, Nb, exact_gelu):
    # x_ref   : (Nb, C, HW) f32   input block (channels on sublanes, HW on lanes)
    # masks_ref: (8, HW)    f32   combined border masks for the 8 non-center taps
    # w12_ref : (2C, 9C)    bf16  fused [conv; gate] 3x3 weights (cols k*C + ci)
    # b1/b2/b3: (C, 1)      f32
    # w3_ref  : (C, C)      bf16  1x1 conv ("linear")
    # o_ref   : (Nb, C, HW) f32
    # col_ref : (9C, Nb*HW) bf16  im2col scratch
    # hn_ref  : (C, Nb*HW)  bf16  normalized activations scratch
    C = o_ref.shape[1]
    HW = H * W

    # ---- Phase 1: build the im2col RHS (lane rotations + masked borders). ----
    # TODO(synk): on v5e prefer per-tap accumulation (patch stays in vregs) to
    # avoid the col_ref store/reload competing with the single vst slot.
    for nb in range(Nb):
        xf = x_ref[nb]                                   # (C, HW) f32
        for k in range(9):
            oy = k // 3 - 1
            ox = k % 3 - 1
            d = oy * W + ox                              # flat spatial shift
            if d == 0:
                patch = xf                               # center tap == input
            else:
                # patch[p] = xf[p + d]  (np.roll semantics: roll by -d); wrap
                # lanes are exactly the zero-padded border positions -> masked.
                patch = pltpu.roll(xf, shift=(-d) % HW, axis=1)
            if k != 4:
                slot = k if k < 4 else k - 1
                patch = patch * masks_ref[pl.ds(slot, 1), :]
            col_ref[pl.ds(k * C, C), pl.ds(nb * HW, HW)] = patch.astype(
                jnp.bfloat16)

    # ---- Phase 2: fused conv + gate 3x3 (one bf16 MXU matmul, f32 acc). ----
    out12 = jnp.dot(w12_ref[...], col_ref[...],
                    preferred_element_type=jnp.float32)   # (2C, Nb*HW) f32
    x1 = out12[:C, :] + b1_ref[...]
    g = out12[C:, :] + b2_ref[...]

    if exact_gelu:
        # Exact (erf) GELU, matching torch.nn.GELU() default.
        inv_sqrt2 = jnp.float32(0.7071067811865476)
        x2 = 0.5 * g * (1.0 + jax.lax.erf(g * inv_sqrt2))
    else:
        # Optional tanh approximation (EUP slot) behind a flag; changes numerics.
        x2 = jax.nn.gelu(g, approximate=True)

    h = x1 * x2                                           # (C, Nb*HW) f32

    # ---- Phase 3: per-(sample, channel) InstanceNorm, one-pass statistics. ----
    inv_hw = jnp.float32(1.0 / HW)
    eps = jnp.float32(1e-5)
    for nb in range(Nb):
        hs = h[:, nb * HW:(nb + 1) * HW]                  # (C, HW)
        mean = jnp.sum(hs, axis=1, keepdims=True) * inv_hw
        meansq = jnp.sum(hs * hs, axis=1, keepdims=True) * inv_hw
        var = jnp.maximum(meansq - mean * mean, 0.0)      # biased variance
        hn = (hs - mean) * jax.lax.rsqrt(var + eps)
        hn_ref[:, pl.ds(nb * HW, HW)] = hn.astype(jnp.bfloat16)

    # ---- Phase 4: 1x1 conv ("linear") + identity residual. ----
    y = jnp.dot(w3_ref[...], hn_ref[...],
                preferred_element_type=jnp.float32) + b3_ref[...]
    for nb in range(Nb):
        o_ref[nb] = (y[:, nb * HW:(nb + 1) * HW] + x_ref[nb]).astype(o_ref.dtype)


def prepare_params(w1, b1, w2, b2, w3, b3):
    """Convert PyTorch-layout parameters to the kernel's matmul layout.

    w1, w2: (C, C, 3, 3) [Cout, Cin, kh, kw]; b1, b2, b3: (C,); w3: (C, C, 1, 1).
    Returns (w12 (2C, 9C) bf16, b1 (C,1), b2 (C,1), w3 (C,C) bf16, b3 (C,1)).
    """
    C = w1.shape[0]
    to_mat = lambda w: jnp.transpose(w, (0, 2, 3, 1)).reshape(C, 9 * C)
    w12 = jnp.concatenate([to_mat(w1), to_mat(w2)], axis=0).astype(jnp.bfloat16)
    return (w12, b1.reshape(C, 1), b2.reshape(C, 1),
            w3.reshape(C, C).astype(jnp.bfloat16), b3.reshape(C, 1))


def _make_border_masks(H, W):
    """(8, HW) f32: combined keep/zero masks for the 8 non-center 3x3 taps."""
    HW = H * W
    pos = jnp.arange(HW, dtype=jnp.int32)
    col = pos % W
    row = pos // W
    m_left = col != 0            # invalid when ox == -1
    m_right = col != W - 1       # invalid when ox == +1
    m_top = row != 0             # invalid when oy == -1
    m_bot = row != H - 1         # invalid when oy == +1
    masks = []
    for k in range(9):
        if k == 4:
            continue
        oy = k // 3 - 1
        ox = k % 3 - 1
        m = jnp.ones((HW,), dtype=bool)
        if ox == -1:
            m = m & m_left
        elif ox == 1:
            m = m & m_right
        if oy == -1:
            m = m & m_top
        elif oy == 1:
            m = m & m_bot
        masks.append(m)
    return jnp.stack(masks, axis=0).astype(jnp.float32)   # (8, HW)


def _vmem_estimate_bytes(nb, C, HW):
    io = 2 * (nb * C * HW * 4) * 2                        # x/out blocks, dbl-buffered
    scratch = 9 * C * nb * HW * 2 + C * nb * HW * 2       # bf16 col + hn
    resident = 2 * (2 * C * 9 * C * 2 + C * C * 2 + 8 * HW * 4 + 3 * C * 4)
    return io + scratch + resident


def _choose_batch_block(N, C, HW, budget_bytes=20 << 20):
    """Largest Nb dividing N that keeps >=2 grid steps (v7x: 2 TCs) and fits VMEM."""
    best = 1
    for nb in range(1, max(1, N // 2) + 1):
        if N % nb == 0 and _vmem_estimate_bytes(nb, C, HW) <= budget_bytes:
            best = nb
    return best


def convblock_forward(x_nchw, prepared_params, *, exact_gelu=True):
    """x_nchw: (N, C, H, W) float32; prepared_params from prepare_params()."""
    N, C, H, W = x_nchw.shape
    HW = H * W
    # TODO(synk): if HW is not a multiple of 128, pad the lane axis in the
    # wrapper and mask the pad lanes inside the InstanceNorm reductions.
    assert HW % 128 == 0, "H*W must be a multiple of 128 for lane-dense tiles"

    w12, b1, b2, w3, b3 = prepared_params
    masks = _make_border_masks(H, W)
    x_flat = x_nchw.reshape(N, C, HW)         # contiguous: no transpose, no pad

    Nb = _choose_batch_block(N, C, HW)
    kernel = functools.partial(convblock_kernel, H=H, W=W, Nb=Nb,
                               exact_gelu=exact_gelu)
    out_flat = pl.pallas_call(
        kernel,
        out_shape=jax.ShapeDtypeStruct((N, C, HW), jnp.float32),
        grid_spec=pltpu.PrefetchScalarGridSpec(
            num_scalar_prefetch=0,
            grid=(N // Nb,),
            in_specs=[
                pl.BlockSpec((Nb, C, HW), lambda n: (n, 0, 0)),
                pl.BlockSpec((8, HW), lambda n: (0, 0)),
                pl.BlockSpec((2 * C, 9 * C), lambda n: (0, 0)),
                pl.BlockSpec((C, 1), lambda n: (0, 0)),
                pl.BlockSpec((C, 1), lambda n: (0, 0)),
                pl.BlockSpec((C, C), lambda n: (0, 0)),
                pl.BlockSpec((C, 1), lambda n: (0, 0)),
            ],
            out_specs=pl.BlockSpec((Nb, C, HW), lambda n: (n, 0, 0)),
            scratch_shapes=[
                pltpu.VMEM((9 * C, Nb * HW), jnp.bfloat16),   # im2col RHS
                pltpu.VMEM((C, Nb * HW), jnp.bfloat16),       # normalized acts
            ],
        ),
        compiler_params=pltpu.CompilerParams(
            dimension_semantics=("parallel",),
        ),
    )(x_flat, masks, w12, b1, b2, w3, b3)
    return out_flat.reshape(N, C, H, W)


def convblock_ref(x, w1, b1, w2, b2, w3, b3):
    """Pure-JAX reference (mirrors the PyTorch module, f32)."""
    dn = ("NCHW", "OIHW", "NCHW")
    conv = lambda v, w, p: jax.lax.conv_general_dilated(
        v, w, window_strides=(1, 1), padding=((p, p), (p, p)),
        dimension_numbers=dn)
    x1 = conv(x, w1, 1) + b1[None, :, None, None]
    g = conv(x, w2, 1) + b2[None, :, None, None]
    x2 = 0.5 * g * (1.0 + jax.lax.erf(g * jnp.float32(0.7071067811865476)))
    out = x1 * x2
    mean = out.mean(axis=(2, 3), keepdims=True)
    var = ((out - mean) ** 2).mean(axis=(2, 3), keepdims=True)
    out = (out - mean) * jax.lax.rsqrt(var + 1e-5)
    out = conv(out, w3, 0) + b3[None, :, None, None]
    return out + x


def init_params(key, C):
    """Deterministic synthetic parameters in PyTorch layout (in_ch==out_ch==C)."""
    ks = jax.random.split(key, 6)
    s = 0.05
    w1 = s * jax.random.normal(ks[0], (C, C, 3, 3), jnp.float32)   # self.conv
    b1 = s * jax.random.normal(ks[1], (C,), jnp.float32)
    w2 = s * jax.random.normal(ks[2], (C, C, 3, 3), jnp.float32)   # self.gate[0]
    b2 = s * jax.random.normal(ks[3], (C,), jnp.float32)
    w3 = s * jax.random.normal(ks[4], (C, C, 1, 1), jnp.float32)   # self.linear
    b3 = s * jax.random.normal(ks[5], (C,), jnp.float32)
    return w1, b1, w2, b2, w3, b3


if __name__ == "__main__":
    key = jax.random.PRNGKey(0)
    k_x, k_p = jax.random.split(key)

    N, C, H, W = 2, 16, 16, 16
    x = jax.random.normal(k_x, (N, C, H, W), jnp.float32)
    torch_params = init_params(k_p, C)
    params = prepare_params(*torch_params)

    out = convblock_forward(x, params)
    jax.block_until_ready(out)
    assert out.shape == (N, C, H, W), out.shape
    assert out.dtype == jnp.float32

    ref = convblock_ref(x, *torch_params)
    err = float(jnp.max(jnp.abs(out - ref)))
    # bf16 MXU operands (f32 accumulate) vs a pure-f32 reference: allow a small
    # quantization tolerance; structural bugs would be orders of magnitude larger.
    assert err < 2e-2, f"max abs err vs reference: {err}"
    print("KERNEL_OK")
</pallas_src>

<mosaic_0001>
module attributes {stable_mosaic.version = 11 : i64} {
  func.func @convblock_kernel(%arg0: i32, %arg1: memref<1x16x256xf32, #tpu.memory_space<vmem>>, %arg2: memref<8x256xf32, #tpu.memory_space<vmem>>, %arg3: memref<32x144xbf16, #tpu.memory_space<vmem>>, %arg4: memref<16x1xf32, #tpu.memory_space<vmem>>, %arg5: memref<16x1xf32, #tpu.memory_space<vmem>>, %arg6: memref<16x16xbf16, #tpu.memory_space<vmem>>, %arg7: memref<16x1xf32, #tpu.memory_space<vmem>>, %arg8: memref<1x16x256xf32, #tpu.memory_space<vmem>>, %arg9: memref<144x256xbf16, #tpu.memory_space<vmem>>, %arg10: memref<16x256xbf16, #tpu.memory_space<vmem>>) attributes {dimension_semantics = [#tpu.dimension_semantics<parallel>], iteration_bounds = array<i64: 2>, scalar_prefetch = 0 : i64, scratch_operands = 2 : i64, tpu.core_type = #tpu.core_type<tc>, window_params = [{transform_indices = @transform_0, window_bounds = array<i64: 1, 16, 256>}, {pipeline_mode = #tpu.pipeline_mode<synchronous>, transform_indices = @transform_1, window_bounds = array<i64: 8, 256>}, {pipeline_mode = #tpu.pipeline_mode<synchronous>, transform_indices = @transform_2, window_bounds = array<i64: 32, 144>}, {pipeline_mode = #tpu.pipeline_mode<synchronous>, transform_indices = @transform_3, window_bounds = array<i64: 16, 1>}, {pipeline_mode = #tpu.pipeline_mode<synchronous>, transform_indices = @transform_4, window_bounds = array<i64: 16, 1>}, {pipeline_mode = #tpu.pipeline_mode<synchronous>, transform_indices = @transform_5, window_bounds = array<i64: 16, 16>}, {pipeline_mode = #tpu.pipeline_mode<synchronous>, transform_indices = @transform_6, window_bounds = array<i64: 16, 1>}, {transform_indices = @transform_7, window_bounds = array<i64: 1, 16, 256>}]} {
    %c0 = arith.constant 0 : index
    %c0_0 = arith.constant 0 : index
    %c0_1 = arith.constant 0 : index
    %0 = vector.load %arg1[%c0, %c0_0, %c0_1] : memref<1x16x256xf32, #tpu.memory_space<vmem>>, vector<1x16x256xf32>
    %1 = vector.shape_cast %0 : vector<1x16x256xf32> to vector<16x256xf32>
    %c17_i32 = arith.constant 17 : i32
    %2 = tpu.dynamic_rotate %1 by %c17_i32 dim 1 : vector<16x256xf32>, i32 -> vector<16x256xf32>
    %c0_2 = arith.constant 0 : index
    %c0_3 = arith.constant 0 : index
    %3 = vector.load %arg2[%c0_2, %c0_3] : memref<8x256xf32, #tpu.memory_space<vmem>>, vector<1x256xf32>
    %4 = vector.broadcast %3 : vector<1x256xf32> to vector<16x256xf32>
    %5 = arith.mulf %2, %4 : vector<16x256xf32>
    %6 = arith.truncf %5 : vector<16x256xf32> to vector<16x256xbf16>
    %c0_4 = arith.constant 0 : index
    %c0_5 = arith.constant 0 : index
    %7 = vector.load %arg9[%c0_4, %c0_5] : memref<144x256xbf16, #tpu.memory_space<vmem>>, vector<16x256xbf16>
    tpu.vector_store %arg9[%c0_4, %c0_5], %6 {strides = array<i32>} : memref<144x256xbf16, #tpu.memory_space<vmem>>, vector<16x256xbf16>,
    %c16_i32 = arith.constant 16 : i32
    %8 = tpu.dynamic_rotate %1 by %c16_i32 dim 1 : vector<16x256xf32>, i32 -> vector<16x256xf32>
    %c1 = arith.constant 1 : index
    %c0_6 = arith.constant 0 : index
    %9 = vector.load %arg2[%c1, %c0_6] : memref<8x256xf32, #tpu.memory_space<vmem>>, vector<1x256xf32>
    %10 = vector.broadcast %9 : vector<1x256xf32> to vector<16x256xf32>
    %11 = arith.mulf %8, %10 : vector<16x256xf32>
    %12 = arith.truncf %11 : vector<16x256xf32> to vector<16x256xbf16>
    %c16 = arith.constant 16 : index
    %c0_7 = arith.constant 0 : index
    %13 = vector.load %arg9[%c16, %c0_7] : memref<144x256xbf16, #tpu.memory_space<vmem>>, vector<16x256xbf16>
    tpu.vector_store %arg9[%c16, %c0_7], %12 {strides = array<i32>} : memref<144x256xbf16, #tpu.memory_space<vmem>>, vector<16x256xbf16>,
    %c15_i32 = arith.constant 15 : i32
    %14 = tpu.dynamic_rotate %1 by %c15_i32 dim 1 : vector<16x256xf32>, i32 -> vector<16x256xf32>
    %c2 = arith.constant 2 : index
    %c0_8 = arith.constant 0 : index
    %15 = vector.load %arg2[%c2, %c0_8] : memref<8x256xf32, #tpu.memory_space<vmem>>, vector<1x256xf32>
    %16 = vector.broadcast %15 : vector<1x256xf32> to vector<16x256xf32>
    %17 = arith.mulf %14, %16 : vector<16x256xf32>
    %18 = arith.truncf %17 : vector<16x256xf32> to vector<16x256xbf16>
    %c32 = arith.constant 32 : index
    %c0_9 = arith.constant 0 : index
    %19 = vector.load %arg9[%c32, %c0_9] : memref<144x256xbf16, #tpu.memory_space<vmem>>, vector<16x256xbf16>
    tpu.vector_store %arg9[%c32, %c0_9], %18 {strides = array<i32>} : memref<144x256xbf16, #tpu.memory_space<vmem>>, vector<16x256xbf16>,
    %c1_i32 = arith.constant 1 : i32
    %20 = tpu.dynamic_rotate %1 by %c1_i32 dim 1 : vector<16x256xf32>, i32 -> vector<16x256xf32>
    %c3 = arith.constant 3 : index
    %c0_10 = arith.constant 0 : index
    %21 = vector.load %arg2[%c3, %c0_10] : memref<8x256xf32, #tpu.memory_space<vmem>>, vector<1x256xf32>
    %22 = vector.broadcast %21 : vector<1x256xf32> to vector<16x256xf32>
    %23 = arith.mulf %20, %22 : vector<16x256xf32>
    %24 = arith.truncf %23 : vector<16x256xf32> to vector<16x256xbf16>
    %c48 = arith.constant 48 : index
    %c0_11 = arith.constant 0 : index
    %25 = vector.load %arg9[%c48, %c0_11] : memref<144x256xbf16, #tpu.memory_space<vmem>>, vector<16x256xbf16>
    tpu.vector_store %arg9[%c48, %c0_11], %24 {strides = array<i32>} : memref<144x256xbf16, #tpu.memory_space<vmem>>, vector<16x256xbf16>,
    %26 = arith.truncf %1 : vector<16x256xf32> to vector<16x256xbf16>
    %c64 = arith.constant 64 : index
    %c0_12 = arith.constant 0 : index
    %27 = vector.load %arg9[%c64, %c0_12] : memref<144x256xbf16, #tpu.memory_space<vmem>>, vector<16x256xbf16>
    tpu.vector_store %arg9[%c64, %c0_12], %26 {strides = array<i32>} : memref<144x256xbf16, #tpu.memory_space<vmem>>, vector<16x256xbf16>,
    %c255_i32 = arith.constant 255 : i32
    %28 = tpu.dynamic_rotate %1 by %c255_i32 dim 1 : vector<16x256xf32>, i32 -> vector<16x256xf32>
    %c4 = arith.constant 4 : index
    %c0_13 = arith.constant 0 : index
    %29 = vector.load %arg2[%c4, %c0_13] : memref<8x256xf32, #tpu.memory_space<vmem>>, vector<1x256xf32>
    %30 = vector.broadcast %29 : vector<1x256xf32> to vector<16x256xf32>
    %31 = arith.mulf %28, %30 : vector<16x256xf32>
    %32 = arith.truncf %31 : vector<16x256xf32> to vector<16x256xbf16>
    %c80 = arith.constant 80 : index
    %c0_14 = arith.constant 0 : index
    %33 = vector.load %arg9[%c80, %c0_14] : memref<144x256xbf16, #tpu.memory_space<vmem>>, vector<16x256xbf16>
    tpu.vector_store %arg9[%c80, %c0_14], %32 {strides = array<i32>} : memref<144x256xbf16, #tpu.memory_space<vmem>>, vector<16x256xbf16>,
    %c241_i32 = arith.constant 241 : i32
    %34 = tpu.dynamic_rotate %1 by %c241_i32 dim 1 : vector<16x256xf32>, i32 -> vector<16x256xf32>
    %c5 = arith.constant 5 : index
    %c0_15 = arith.constant 0 : index
    %35 = vector.load %arg2[%c5, %c0_15] : memref<8x256xf32, #tpu.memory_space<vmem>>, vector<1x256xf32>
    %36 = vector.broadcast %35 : vector<1x256xf32> to vector<16x256xf32>
    %37 = arith.mulf %34, %36 : vector<16x256xf32>
    %38 = arith.truncf %37 : vector<16x256xf32> to vector<16x256xbf16>
    %c96 = arith.constant 96 : index
    %c0_16 = arith.constant 0 : index
    %39 = vector.load %arg9[%c96, %c0_16] : memref<144x256xbf16, #tpu.memory_space<vmem>>, vector<16x256xbf16>
    tpu.vector_store %arg9[%c96, %c0_16], %38 {strides = array<i32>} : memref<144x256xbf16, #tpu.memory_space<vmem>>, vector<16x256xbf16>,
    %c240_i32 = arith.constant 240 : i32
    %40 = tpu.dynamic_rotate %1 by %c240_i32 dim 1 : vector<16x256xf32>, i32 -> vector<16x256xf32>
    %c6 = arith.constant 6 : index
    %c0_17 = arith.constant 0 : index
    %41 = vector.load %arg2[%c6, %c0_17] : memref<8x256xf32, #tpu.memory_space<vmem>>, vector<1x256xf32>
    %42 = vector.broadcast %41 : vector<1x256xf32> to vector<16x256xf32>
    %43 = arith.mulf %40, %42 : vector<16x256xf32>
    %44 = arith.truncf %43 : vector<16x256xf32> to vector<16x256xbf16>
    %c112 = arith.constant 112 : index
    %c0_18 = arith.constant 0 : index
    %45 = vector.load %arg9[%c112, %c0_18] : memref<144x256xbf16, #tpu.memory_space<vmem>>, vector<16x256xbf16>
    tpu.vector_store %arg9[%c112, %c0_18], %44 {strides = array<i32>} : memref<144x256xbf16, #tpu.memory_space<vmem>>, vector<16x256xbf16>,
    %c239_i32 = arith.constant 239 : i32
    %46 = tpu.dynamic_rotate %1 by %c239_i32 dim 1 : vector<16x256xf32>, i32 -> vector<16x256xf32>
    %c7 = arith.constant 7 : index
    %c0_19 = arith.constant 0 : index
    %47 = vector.load %arg2[%c7, %c0_19] : memref<8x256xf32, #tpu.memory_space<vmem>>, vector<1x256xf32>
    %48 = vector.broadcast %47 : vector<1x256xf32> to vector<16x256xf32>
    %49 = arith.mulf %46, %48 : vector<16x256xf32>
    %50 = arith.truncf %49 : vector<16x256xf32> to vector<16x256xbf16>
    %c128 = arith.constant 128 : index
    %c0_20 = arith.constant 0 : index
    %51 = vector.load %arg9[%c128, %c0_20] : memref<144x256xbf16, #tpu.memory_space<vmem>>, vector<16x256xbf16>
    tpu.vector_store %arg9[%c128, %c0_20], %50 {strides = array<i32>} : memref<144x256xbf16, #tpu.memory_space<vmem>>, vector<16x256xbf16>,
    %c0_21 = arith.constant 0 : index
    %c0_22 = arith.constant 0 : index
    %52 = vector.load %arg3[%c0_21, %c0_22] : memref<32x144xbf16, #tpu.memory_space<vmem>>, vector<32x144xbf16>
    %c0_23 = arith.constant 0 : index
    %c0_24 = arith.constant 0 : index
    %53 = vector.load %arg9[%c0_23, %c0_24] : memref<144x256xbf16, #tpu.memory_space<vmem>>, vector<144x256xbf16>
    %cst = arith.constant dense<0.000000e+00> : vector<32x256xf32>
    %54 = tpu.matmul %52, %53, %cst {dimension_numbers = #tpu.dot_dimension_numbers<[1], [0], [0], [1], [0, 0, 1, 1], [], []>} : vector<32x144xbf16>, vector<144x256xbf16>, vector<32x256xf32> -> vector<32x256xf32>
    %55 = vector.extract_strided_slice %54 {offsets = [0, 0], sizes = [16, 256], strides = [1, 1]} : vector<32x256xf32> to vector<16x256xf32>
    %c0_25 = arith.constant 0 : index
    %c0_26 = arith.constant 0 : index
    %56 = vector.load %arg4[%c0_25, %c0_26] : memref<16x1xf32, #tpu.memory_space<vmem>>, vector<16x1xf32>
    %57 = vector.broadcast %56 : vector<16x1xf32> to vector<16x256xf32>
    %58 = arith.addf %55, %57 : vector<16x256xf32>
    %59 = vector.extract_strided_slice %54 {offsets = [16, 0], sizes = [16, 256], strides = [1, 1]} : vector<32x256xf32> to vector<16x256xf32>
    %c0_27 = arith.constant 0 : index
    %c0_28 = arith.constant 0 : index
    %60 = vector.load %arg5[%c0_27, %c0_28] : memref<16x1xf32, #tpu.memory_space<vmem>>, vector<16x1xf32>
    %61 = vector.broadcast %60 : vector<16x1xf32> to vector<16x256xf32>
    %62 = arith.addf %59, %61 : vector<16x256xf32>
    %cst_29 = arith.constant 5.000000e-01 : f32
    %63 = vector.broadcast %cst_29 : f32 to vector<16x256xf32>
    %64 = arith.mulf %63, %62 : vector<16x256xf32>
    %cst_30 = arith.constant 0.707106769 : f32
    %65 = vector.broadcast %cst_30 : f32 to vector<16x256xf32>
    %66 = arith.mulf %62, %65 : vector<16x256xf32>
    %67 = math.erf %66 : vector<16x256xf32>
    %cst_31 = arith.constant 1.000000e+00 : f32
    %68 = vector.broadcast %cst_31 : f32 to vector<16x256xf32>
    %69 = arith.addf %68, %67 : vector<16x256xf32>
    %70 = arith.mulf %64, %69 : vector<16x256xf32>
    %71 = arith.mulf %58, %70 : vector<16x256xf32>
    %cst_32 = arith.constant dense<0.000000e+00> : vector<16xf32>
    %72 = vector.multi_reduction <add>, %71, %cst_32 [1] : vector<16x256xf32> to vector<16xf32>
    %73 = vector.shape_cast %72 : vector<16xf32> to vector<16x1xf32>
    %cst_33 = arith.constant 3.906250e-03 : f32
    %74 = vector.broadcast %cst_33 : f32 to vector<16x1xf32>
    %75 = arith.mulf %73, %74 : vector<16x1xf32>
    %76 = arith.mulf %71, %71 : vector<16x256xf32>
    %cst_34 = arith.constant dense<0.000000e+00> : vector<16xf32>
    %77 = vector.multi_reduction <add>, %76, %cst_34 [1] : vector<16x256xf32> to vector<16xf32>
    %78 = vector.shape_cast %77 : vector<16xf32> to vector<16x1xf32>
    %cst_35 = arith.constant 3.906250e-03 : f32
    %79 = vector.broadcast %cst_35 : f32 to vector<16x1xf32>
    %80 = arith.mulf %78, %79 : vector<16x1xf32>
    %81 = arith.mulf %75, %75 : vector<16x1xf32>
    %82 = arith.subf %80, %81 : vector<16x1xf32>
    %cst_36 = arith.constant 0.000000e+00 : f32
    %83 = vector.broadcast %cst_36 : f32 to vector<16x1xf32>
    %84 = arith.maximumf %82, %83 : vector<16x1xf32>
    %85 = vector.broadcast %75 : vector<16x1xf32> to vector<16x256xf32>
    %86 = arith.subf %71, %85 : vector<16x256xf32>
    %cst_37 = arith.constant 9.99999974E-6 : f32
    %87 = vector.broadcast %cst_37 : f32 to vector<16x1xf32>
    %88 = arith.addf %84, %87 : vector<16x1xf32>
    %89 = math.rsqrt %88 : vector<16x1xf32>
    %90 = vector.broadcast %89 : vector<16x1xf32> to vector<16x256xf32>
    %91 = arith.mulf %86, %90 : vector<16x256xf32>
    %92 = arith.truncf %91 : vector<16x256xf32> to vector<16x256xbf16>
    %c0_38 = arith.constant 0 : index
    %c0_39 = arith.constant 0 : index
    %93 = vector.load %arg10[%c0_38, %c0_39] : memref<16x256xbf16, #tpu.memory_space<vmem>>, vector<16x256xbf16>
    tpu.vector_store %arg10[%c0_38, %c0_39], %92 {strides = array<i32>} : memref<16x256xbf16, #tpu.memory_space<vmem>>, vector<16x256xbf16>,
    %c0_40 = arith.constant 0 : index
    %c0_41 = arith.constant 0 : index
    %94 = vector.load %arg6[%c0_40, %c0_41] : memref<16x16xbf16, #tpu.memory_space<vmem>>, vector<16x16xbf16>
    %c0_42 = arith.constant 0 : index
    %c0_43 = arith.constant 0 : index
    %95 = vector.load %arg10[%c0_42, %c0_43] : memref<16x256xbf16, #tpu.memory_space<vmem>>, vector<16x256xbf16>
    %cst_44 = arith.constant dense<0.000000e+00> : vector<16x256xf32>
    %96 = tpu.matmul %94, %95, %cst_44 {dimension_numbers = #tpu.dot_dimension_numbers<[1], [0], [0], [1], [0, 0, 1, 1], [], []>} : vector<16x16xbf16>, vector<16x256xbf16>, vector<16x256xf32> -> vector<16x256xf32>
    %c0_45 = arith.constant 0 : index
    %c0_46 = arith.constant 0 : index
    %97 = vector.load %arg7[%c0_45, %c0_46] : memref<16x1xf32, #tpu.memory_space<vmem>>, vector<16x1xf32>
    %98 = vector.broadcast %97 : vector<16x1xf32> to vector<16x256xf32>
    %99 = arith.addf %96, %98 : vector<16x256xf32>
    %c0_47 = arith.constant 0 : index
    %c0_48 = arith.constant 0 : index
    %c0_49 = arith.constant 0 : index
    %100 = vector.load %arg1[%c0_47, %c0_48, %c0_49] : memref<1x16x256xf32, #tpu.memory_space<vmem>>, vector<1x16x256xf32>
    %101 = vector.shape_cast %100 : vector<1x16x256xf32> to vector<16x256xf32>
    %102 = arith.addf %99, %101 : vector<16x256xf32>
    %c0_50 = arith.constant 0 : index
    %c0_51 = arith.constant 0 : index
    %c0_52 = arith.constant 0 : index
    %103 = vector.load %arg8[%c0_50, %c0_51, %c0_52] : memref<1x16x256xf32, #tpu.memory_space<vmem>>, vector<1x16x256xf32>
    %104 = vector.shape_cast %103 : vector<1x16x256xf32> to vector<16x256xf32>
    %105 = vector.shape_cast %102 : vector<16x256xf32> to vector<1x16x256xf32>
    tpu.vector_store %arg8[%c0_50, %c0_51, %c0_52], %105 {strides = array<i32>} : memref<1x16x256xf32, #tpu.memory_space<vmem>>, vector<1x16x256xf32>,
    return
  }
  func.func @transform_0(%arg0: i32) -> (i32, i32, i32) {
    %c0_i32 = arith.constant 0 : i32
    %c0_i32_0 = arith.constant 0 : i32
    %c0_i32_1 = arith.constant 0 : i32
    return %arg0, %c0_i32, %c0_i32_0 : i32, i32, i32
  }
  func.func @transform_1(%arg0: i32) -> (i32, i32) {
    %c0_i32 = arith.constant 0 : i32
    %c0_i32_0 = arith.constant 0 : i32
    %c0_i32_1 = arith.constant 0 : i32
    return %c0_i32, %c0_i32_0 : i32, i32
  }
  func.func @transform_2(%arg0: i32) -> (i32, i32) {
    %c0_i32 = arith.constant 0 : i32
    %c0_i32_0 = arith.constant 0 : i32
    %c0_i32_1 = arith.constant 0 : i32
    return %c0_i32, %c0_i32_0 : i32, i32
  }
  func.func @transform_3(%arg0: i32) -> (i32, i32) {
    %c0_i32 = arith.constant 0 : i32
    %c0_i32_0 = arith.constant 0 : i32
    %c0_i32_1 = arith.constant 0 : i32
    return %c0_i32, %c0_i32_0 : i32, i32
  }
  func.func @transform_4(%arg0: i32) -> (i32, i32) {
    %c0_i32 = arith.constant 0 : i32
    %c0_i32_0 = arith.constant 0 : i32
    %c0_i32_1 = arith.constant 0 : i32
    return %c0_i32, %c0_i32_0 : i32, i32
  }
  func.func @transform_5(%arg0: i32) -> (i32, i32) {
    %c0_i32 = arith.constant 0 : i32
    %c0_i32_0 = arith.constant 0 : i32
    %c0_i32_1 = arith.constant 0 : i32
    return %c0_i32, %c0_i32_0 : i32, i32
  }
  func.func @transform_6(%arg0: i32) -> (i32, i32) {
    %c0_i32 = arith.constant 0 : i32
    %c0_i32_0 = arith.constant 0 : i32
    %c0_i32_1 = arith.constant 0 : i32
    return %c0_i32, %c0_i32_0 : i32, i32
  }
  func.func @transform_7(%arg0: i32) -> (i32, i32, i32) {
    %c0_i32 = arith.constant 0 : i32
    %c0_i32_0 = arith.constant 0 : i32
    %c0_i32_1 = arith.constant 0 : i32
    return %arg0, %c0_i32, %c0_i32_0 : i32, i32, i32
  }
}

</mosaic_0001>

<bundles_post_ra>
// kernel: tpu_custom_call.1
= control target key start
LH: loop header
LB: loop body
LE: loop exit
PB: predicated region body
PF: predicated region fallthrough
CT: control target
= control target key end

     0   :  { %12 = vsyncpa [#allocation5], 0  ;;  %s1514_s0 = inlined_call_operand.hbm [shape: f32[2,16,256], index: 0, kind: input, shape index: {}]   ;;  %s1515_s1 = inlined_call_operand.vmem [shape: f32[8,256], index: 1, kind: input, shape index: {}]   ;;  %s1516_s2 = inlined_call_operand.vmem [shape: bf16[32,144], index: 2, kind: input, shape index: {}]   ;;  %s1517_s3 = inlined_call_operand.vmem [shape: f32[16,1], index: 3, kind: input, shape index: {}]   ;;  %s1518_s4 = inlined_call_operand.vmem [shape: f32[16,1], index: 4, kind: input, shape index: {}]   ;;  %s1519_s5 = inlined_call_operand.vmem [shape: bf16[16,16], index: 5, kind: input, shape index: {}]   ;;  %s1520_s6 = inlined_call_operand.vmem [shape: f32[16,1], index: 6, kind: input, shape index: {}]   ;;  %s1521_s7 = inlined_call_operand.hbm [shape: f32[2,16,256], index: 7, kind: output, shape index: {}]  }
   0x1   :  { %14 = vsyncpa [#allocation5 + $0x1], 0 }
   0x2   :  { %15 = vsyncpa [#allocation6], 0 }
   0x3   :  { %17 = vsyncpa [#allocation6 + $0x1], 0  ;;  %s1205_s24 = smov 0   ;;  %s1207_s25 = smov 0  }
   0x4   :  { %s1209_s26 = smov 0   ;;  %s1211_s27 = smov 0  }
   0x5 LB: > { %s1226_s28 = sadd.s32 4294967295, %s1149_s27   ;;  %s943_s29 = sadd.s32 4294967294, %s1149_s27   ;;  %s1149_s27 = sphi %s1211_s27, %s1534_s27   ;;  %s1145_s26 = sphi %s1209_s26, %s1533_s26   ;;  %s1141_s25 = sphi %s1207_s25, %s1532_s25   ;;  %s1137_s24 = sphi %s1205_s24, %s1531_s24  }
   0x6   : > { %s1230_s30 = sadd.s32 1, %s1149_s27   ;;  %s30_s8 = sadd.s32 1, %s1145_s26 }
   0x7   : > { %s27_s9 = ssub.s32 %s1149_s27, %s1230_s30  ;;  %p37_p0 = scmp.ne.s32.totalorder %s1145_s26, %s1141_s25 }
   0x8   : > { %p28_p1 = scmp.eq.s32.totalorder %s27_s9, 0  ;;  %p38_p2 = scmp.eq.s32.totalorder %s1149_s27, 0 }
   0x9   : > { %p43_p3 = scmp.ne.s32.totalorder %s1141_s25, %s1137_s24  ;;  %p44_p4 = scmp.eq.s32.totalorder %s1226_s28, 0 }
   0xa   : > { %s1242_s10 = scalar_select %p28_p1, %s1145_s26, %s30_s8  }
   0xb   : > { %p1244_p5 = por %p38_p2, %p37_p0  ;;  %p1248_p6 = por %p44_p4, %p43_p3 }
   0xc   : > { %p193_p7 = scmp.eq.s32.totalorder %s1226_s28, 1  ;;  %p199_p8 = scmp.eq.s32.totalorder %s943_s29, 1 }
   0xd   : > { %p986_p10 = scmp.lt.s32.totalorder %s1149_s27, 2  ;;  %s237_s15 = sand.u32 1, %s1145_s26  }
   0xe   : > { %p1255_p11 = por %p193_p7, %p37_p0  ;;  %p1259_p12 = por %p199_p8, %p43_p3 }
   0xf   : > { %s972_s16 = sshll.u32 %s1149_s27, 9  ;;  %s946_s17 = sshll.u32 %s237_s15, 5 }
  0x10   : > { %s1525_s13 = scalar_select %p1255_p11, 1, 0 }
  0x11   : > { %s1526_s14 = scalar_select %p1259_p12, 1, 0 }
  0x12   : > { %s1268_s20 = scalar_lea.hbm %s1514_s0, %s972_s16  ;;  %s241_s21 = scalar_lea.vmem [#allocation4], %s946_s17 }
  0x13   : > { %s248_s22 = sshll.u32 %s241_s21, 4  ;;  %p1272_p13 = pnand %p986_p10, %p1244_p5  ;;  %s1276_s22 = int_to_ptr.vmem [resolvable:$true] %s248_s22 }
  0x14   : > { %s1278_s29 = scalar_lea.sflag [#allocation5], %s237_s15  ;;  %s1053_s8 = scalar_lea.hbm %s1268_s20, 512 }
  0x15   : > { %p1054_p0 = scmp.ne.s32.totalorder %s1268_s20, %s1053_s8  ;;  %p1055_p1 = pneg %p1272_p13 }
  0x16   : > { %s1058_s16 = scalar_lea.hbm %s1514_s0, 1024  ;;  %p1059_p4 = scmp.lt.u32.totalorder %s1268_s20, %s1514_s0 }
  0x17   : > { %p1056_p2 = pnand %p1055_p1, %p1054_p0  ;;  %p1060_p5 = scmp.lt.u32.totalorder %s1058_s16, %s1053_s8 }
  0x18   : > { %p1062_p8 = scmp.lt.u32.totalorder %s1053_s8, %s1268_s20 }
  0x19   : > { %p1057_p3 = pneg %p1056_p2  ;;  %p1061_p7 = por %p1060_p5, %p1059_p4 }
  0x1b   : > { %p1063_p10 = por %p1062_p8, %p1061_p7 }
  0x1d   : > { %p1064_p9 = pnand %p1063_p10, %p1057_p3 }
  0x1f   : > { %1067 = shalt.err (!%p1064_p9)
}
  0x20   : > { %s1068_s15 = scalar_lea.vmem %s1276_s22, 512  ;;  %s1151_s19 = smov [#allocation4]  }
  0x21   : > { %p1069_p0 = scmp.ne.s32.totalorder %s1276_s22, %s1068_s15  ;;  %s1073_s21 = sshll.u32 %s1151_s19, 4  ;;  %s1074_s21 = int_to_ptr.vmem [resolvable:$false] %s1073_s21 }
  0x22   : > { %s1075_s9 = scalar_lea.vmem %s1074_s21, 1024  ;;  %p1076_p11 = scmp.lt.s32.totalorder %s1276_s22, %s1074_s21 }
  0x23   : > { %p1071_p2 = pnand %p1069_p0, %p1055_p1  ;;  %p1077_p4 = scmp.lt.s32.totalorder %s1075_s9, %s1068_s15 }
  0x25   : > { %p1072_p12 = pneg %p1071_p2  ;;  %p1078_p5 = por %p1077_p4, %p1076_p11 }
  0x27   : > { %p1079_p7 = pnand %p1078_p5, %p1072_p12 }
  0x29   : > { %1082 = shalt.err (!%p1079_p7)
}
  0x2a   : > { %s1152_s8 = smov 256   ;;  %s1153_s11 = smov 16  }
  0x2b   : > { %981 = dma.hbm_to_vmem [thread:$0]  (!%p1272_p13), %s1268_s20, 512, %s1276_s22, %s1278_s29, %s1152_s8, %s1152_s8, %s1153_s11  }
  0x2c   : > { %p949_p9 = scmp.ge.s32.totalorder %s1149_s27, 1  ;;  %p256_p1 = scmp.lt.s32.totalorder %s1149_s27, 3 }
  0x2e   : > { %p257_p3 = pnand %p949_p9, %p256_p1 }
  0x2f   : > { %s1309_s16 = sand.u32 (!%p257_p3), 1, %s1141_s25  }
  0x30   : > { %260 = sbr.rel (%p257_p3) target bundleno = 894 (0x37e), region = 48  ;;  %s950_s17 = sshll.u32 (!%p257_p3), %s1309_s16, 5 }
  0x31   : > { %s263_s18 = scalar_lea.sflag (!%p257_p3), [#allocation5], %s1309_s16  ;;  %s266_s15 = scalar_lea.vmem (!%p257_p3), [#allocation4], %s950_s17 }
  0x37   : > { %1128 = dma.done.wait (%p1248_p6), %s263_s18, 512  }
  0x38   : > { %1130 = vsyncadd (%p1248_p6), %s263_s18, 4294966784  ;;  %v1319_v0 = vld [vmem:[%s266_s15 + $0x8] sm:$0xff]  ;;  %v1321_v1 = vld [vmem:[%s266_s15] sm:$0xff]  ;;  %s1154_s20 = smov 17   ;;  %s1155_s22 = smov 16   ;;  %vm619_vm0 = vcmask 130048   ;;  %v310_v10 = vlaneseq }
  0x39   : > { %306 = vrot.lane.b32.xlu1 %v1319_v0, %s1154_s20  ;;  %302 = vrot.lane.b32.xlu0 %v1321_v1, %s1154_s20  ;;  %v1325_v2 = vld [vmem:[%s266_s15 + $0x18] sm:$0xff]  ;;  %v1327_v3 = vld [vmem:[%s266_s15 + $0x10] sm:$0xff]  ;;  %s1156_s12 = smov 15   ;;  %s1157_s23 = smov 1   ;;  %v1162_v7 = vmov 0  }
  0x3a   : > { %s1158_s29 = smov 127   ;;  %s1159_s19 = smov 113   ;;  %v1036_v4 = vld [vmem:[%s1516_s2 + $0x4] ss:$8 sps:$4 sm:$0xff]   ;;  %1033 = vset.pattern.permute.xlu1 %v1162_v7  ;;  %1032 = vset.pattern.permute.xlu0 %v1162_v7  ;;  %v320_v11 = vshrl.u32 %v310_v10, 7  ;;  %v1379_v12 = vand.u32 127, %v310_v10 }
  0x3b   : > { %s1160_s21 = smov 112   ;;  %963 = vmatprep.mubr.msk.bf16.mxu0 %vm619_vm0, %v1036_v4  ;;  %s1161_s11 = smov 111   ;;  %v696_v5 = vld [vmem:[%s1518_s4 + $0x8] sm:$0xff]  ;;  %v695_v6 = vld [vmem:[%s1518_s4] sm:$0xff]  ;;  %833 = vmatprep.mubr.bf16.mxu1 %v1162_v7 }
  0x3c   : > { %v679_v8 = vld [vmem:[%s1517_s3] sm:$0xff]  ;;  %v680_v9 = vld [vmem:[%s1517_s3 + $0x8] sm:$0xff]  ;;  %v1381_v13 = vsub.s32 0, %v320_v11  ;;  %v1383_v14 = vsub.s32 1, %v320_v11  ;;  %vm312_vm1 = vcmp.lt.s32.totalorder %v1379_v12, 17  ;;  %vm345_vm2 = vcmp.lt.s32.totalorder %v1379_v12, 16 }
  0x3d   : > { %308 = vrot.lane.b32.xlu1 %v1325_v2, %s1154_s20  ;;  %304 = vrot.lane.b32.xlu0 %v1327_v3, %s1154_s20  ;;  %v317_v15 = vld [vmem:[%s1515_s1] ss:$8 sm:$0x3]  ;;  %v952_v30 = vld [vmem:[%s1515_s1 + $0x1] ss:$8 sm:$0x3] }
  0x3e   : > { %v322_v18 = vrot.slane %v317_v15, %v1381_v13  ;;  %v326_v19 = vrot.slane %v317_v15, %v1383_v14  ;;  %v356_v35 = vrot.slane %v952_v30, %v1381_v13  ;;  %v360_v36 = vrot.slane %v952_v30, %v1383_v14  ;;  %v953_v47 = vld [vmem:[%s1515_s1 + $0x2] ss:$8 sm:$0x3]  ;;  %v954_v4 = vld [vmem:[%s1515_s1 + $0x3] ss:$8 sm:$0x3] }
  0x3f   : > { %vm379_vm3 = vcmp.lt.s32.totalorder %v1379_v12, 15  ;;  %v390_v52 = vrot.slane %v953_v47, %v1381_v13  ;;  %v394_v53 = vrot.slane %v953_v47, %v1383_v14  ;;  %vm413_vm4 = vcmp.lt.s32.totalorder %v1379_v12, 1  ;;  %p1528_p11 = scmp.ne.s32.totalorder %s1525_s13, 0  ;;  %s1163_s8 = smov [#allocation7]  }
  0x40   : > { %v428_v10 = vrot.slane %v954_v4, %v1383_v14  ;;  %vm451_vm5 = vcmp.lt.s32.totalorder %v1379_v12, 127  ;;  %vm485_vm6 = vcmp.lt.s32.totalorder %v1379_v12, 113  ;;  %vm519_vm7 = vcmp.lt.s32.totalorder %v1379_v12, 112 }
  0x41   : > { %339 = vrot.lane.b32.xlu1 %v1327_v3, %s1155_s22  ;;  %337 = vrot.lane.b32.xlu0 %v1321_v1, %s1155_s22  ;;  %vm553_vm8 = vcmp.lt.s32.totalorder %v1379_v12, 111  ;;  %v1034_v12 = vld [vmem:[%s1516_s2] ss:$8 sps:$4 sm:$0xff]  }
  0x45   : > { %343 = vrot.lane.b32.xlu1 %v1325_v2, %s1155_s22  ;;  %341 = vrot.lane.b32.xlu0 %v1319_v0, %s1155_s22 }
  0x49   : > { %373 = vrot.lane.b32.xlu1 %v1327_v3, %s1156_s12  ;;  %371 = vrot.lane.b32.xlu0 %v1321_v1, %s1156_s12 }
  0x4d   : > { %377 = vrot.lane.b32.xlu1 %v1325_v2, %s1156_s12  ;;  %375 = vrot.lane.b32.xlu0 %v1319_v0, %s1156_s12  ;;  %s296_s12 = scalar_lea.vmem [#allocation7], %s950_s17 }
  0x51   : > { %407 = vrot.lane.b32.xlu1 %v1327_v3, %s1157_s23  ;;  %405 = vrot.lane.b32.xlu0 %v1321_v1, %s1157_s23 }
  0x55   : > { %411 = vrot.lane.b32.xlu1 %v1325_v2, %s1157_s23  ;;  %409 = vrot.lane.b32.xlu0 %v1319_v0, %s1157_s23  ;;  %s870_s23 = sshll.u32 %s296_s12, 4  ;;  %s1462_s23 = int_to_ptr.vmem [resolvable:$true] %s870_s23 }
  0x56   : > { %s1083_s9 = scalar_lea.vmem %s1462_s23, 512 }
  0x57   : > { %p1084_p6 = scmp.ne.s32.totalorder %s1462_s23, %s1083_s9 }
  0x59   : > { %445 = vrot.lane.b32.xlu1 %v1327_v3, %s1158_s29  ;;  %443 = vrot.lane.b32.xlu0 %v1321_v1, %s1158_s29  ;;  %p1085_p12 = pnand %p1084_p6, %p1528_p11 }
  0x5b   : > { %p1086_p13 = pneg %p1085_p12 }
  0x5d   : > { %449 = vrot.lane.b32.xlu1 %v1325_v2, %s1158_s29  ;;  %447 = vrot.lane.b32.xlu0 %v1319_v0, %s1158_s29  ;;  %s973_s29 = sshll.u32 %s1226_s28, 9  ;;  %s857_s28 = scalar_lea.sflag [#allocation6], %s1309_s16 }
  0x61   : > { %479 = vrot.lane.b32.xlu1 %v1327_v3, %s1159_s19  ;;  %477 = vrot.lane.b32.xlu0 %v1321_v1, %s1159_s19 }
  0x65   : > { %483 = vrot.lane.b32.xlu1 %v1325_v2, %s1159_s19  ;;  %481 = vrot.lane.b32.xlu0 %v1319_v0, %s1159_s19 }
  0x69   : > { %513 = vrot.lane.b32.xlu1 %v1327_v3, %s1160_s21  ;;  %511 = vrot.lane.b32.xlu0 %v1321_v1, %s1160_s21 }
  0x6d   : > { %517 = vrot.lane.b32.xlu1 %v1325_v2, %s1160_s21  ;;  %515 = vrot.lane.b32.xlu0 %v1319_v0, %s1160_s21  ;;  %s1469_s21 = scalar_lea.hbm %s1521_s7, %s973_s29 }
  0x71   : > { %547 = vrot.lane.b32.xlu1 %v1327_v3, %s1161_s11  ;;  %545 = vrot.lane.b32.xlu0 %v1321_v1, %s1161_s11 }
  0x75   : > { %551 = vrot.lane.b32.xlu1 %v1325_v2, %s1161_s11  ;;  %549 = vrot.lane.b32.xlu0 %v1319_v0, %s1161_s11  ;;  %s1087_s11 = sshll.u32 %s1163_s8, 4  ;;  %s1088_s11 = int_to_ptr.vmem [resolvable:$false] %s1087_s11 }
  0x76   : > { %s1089_s18 = scalar_lea.vmem %s1088_s11, 1024  ;;  %p1090_p8 = scmp.lt.s32.totalorder %s1462_s23, %s1088_s11 }
  0x77   : > { %p1091_p10 = scmp.lt.s32.totalorder %s1089_s18, %s1083_s9 }
  0x79   : > { %704 = vperm.xlu1 %1033, %v696_v5   ;;  %699 = vperm.xlu0 %1032, %v695_v6   ;;  %p1092_p0 = por %p1091_p10, %p1090_p8 }
  0x7b   : > { %p1093_p2 = pnand %p1092_p0, %p1086_p13 }
  0x7d   : > { %683 = vperm.xlu1 %1033, %v679_v8   ;;  %688 = vperm.xlu0 %1032, %v680_v9   ;;  %v424_v9 = vrot.slane %v954_v4, %v1381_v13 }
  0xab   : > { %v307_v16 = vpop.permute.xlu1 %306  ;;  %v303_v17 = vpop.permute.xlu0 %302 }
  0xac   : > { %v313_v20 = vsel %vm312_vm1, %v303_v17, %v307_v16  ;;  %v315_v21 = vsel %vm312_vm1, %v307_v16, %v303_v17 }
  0xad   : > { %v329_v26 = vmul.f32 %v322_v18, %v315_v21  ;;  %v330_v28 = vmul.f32 %v326_v19, %v313_v20 }
  0xaf   : > { %v309_v22 = vpop.permute.xlu1 %308  ;;  %v305_v23 = vpop.permute.xlu0 %304 }
  0xb0   : > { %v314_v24 = vsel %vm312_vm1, %v305_v23, %v309_v22  ;;  %v316_v25 = vsel %vm312_vm1, %v309_v22, %v305_v23 }
  0xb1   : > { %v331_v27 = vmul.f32 %v322_v18, %v316_v25  ;;  %v332_v29 = vmul.f32 %v326_v19, %v314_v24  ;;  %v955_v24 = vld [vmem:[%s1515_s1 + $0x4] ss:$8 sm:$0x3] }
  0xb2   : > { %v462_v30 = vrot.slane %v955_v24, %v1381_v13 }
  0xb3   : > { %v340_v31 = vpop.permute.xlu1 %339  ;;  %v338_v32 = vpop.permute.xlu0 %337  ;;  %v334_v33 = vpack.c.bf16 %v332_v29, %v330_v28  ;;  %v333_v34 = vpack.c.bf16 %v331_v27, %v329_v26  ;;  %v440_v29 = vpack.c.bf16 %v1325_v2, %v1319_v0 }
  0xb5   : > { %626 = vmatprep.subr.bf16.mxu0 %v334_v33 }
  0xb6   : > { %627 = vmatpush1.bf16.msra.mxu0 %v333_v34 }
  0xb7   : > { %v344_v37 = vpop.permute.xlu1 %343  ;;  %v342_v38 = vpop.permute.xlu0 %341 }
  0xb8   : > { %v347_v39 = vsel %vm345_vm2, %v340_v31, %v344_v37  ;;  %v349_v40 = vsel %vm345_vm2, %v344_v37, %v340_v31  ;;  %v346_v41 = vsel %vm345_vm2, %v338_v32, %v342_v38  ;;  %v348_v42 = vsel %vm345_vm2, %v342_v38, %v338_v32 }
  0xb9   : > { %v365_v43 = vmul.f32 %v356_v35, %v349_v40  ;;  %v366_v44 = vmul.f32 %v360_v36, %v347_v39  ;;  %v363_v45 = vmul.f32 %v356_v35, %v348_v42  ;;  %v364_v46 = vmul.f32 %v360_v36, %v346_v41 }
  0xba   : > { %v466_v31 = vrot.slane %v955_v24, %v1383_v14  ;;  %v439_v32 = vpack.c.bf16 %v1327_v3, %v1321_v1 }
  0xbb   : > { %v374_v48 = vpop.permute.xlu1 %373  ;;  %v372_v49 = vpop.permute.xlu0 %371  ;;  %v368_v50 = vpack.c.bf16 %v366_v44, %v364_v46  ;;  %v367_v51 = vpack.c.bf16 %v365_v43, %v363_v45  ;;  %v956_v43 = vld [vmem:[%s1515_s1 + $0x5] ss:$8 sm:$0x3] }
  0xbd   : > { %628 = vmatprep.subr.bf16.mxu0 %v368_v50 }
  0xbe   : > { %629 = vmatpush1.bf16.msra.mxu0 %v367_v51 }
  0xbf   : > { %v378_v54 = vpop.permute.xlu1 %377  ;;  %v376_v55 = vpop.permute.xlu0 %375 }
  0xc0   : > { %v381_v56 = vsel %vm379_vm3, %v374_v48, %v378_v54  ;;  %v383_v57 = vsel %vm379_vm3, %v378_v54, %v374_v48  ;;  %v380_v58 = vsel %vm379_vm3, %v372_v49, %v376_v55  ;;  %v382_v59 = vsel %vm379_vm3, %v376_v55, %v372_v49 }
  0xc1   : > { %v399_v60 = vmul.f32 %v390_v52, %v383_v57  ;;  %v400_v61 = vmul.f32 %v394_v53, %v381_v56  ;;  %v397_v62 = vmul.f32 %v390_v52, %v382_v59  ;;  %v398_v63 = vmul.f32 %v394_v53, %v380_v58 }
  0xc2   : > { %v496_v48 = vrot.slane %v956_v43, %v1381_v13  ;;  %v500_v49 = vrot.slane %v956_v43, %v1383_v14 }
  0xc3   : > { %v408_v5 = vpop.permute.xlu1 %407  ;;  %v406_v6 = vpop.permute.xlu0 %405  ;;  %v402_v7 = vpack.c.bf16 %v400_v61, %v398_v63  ;;  %v401_v8 = vpack.c.bf16 %v399_v60, %v397_v62  ;;  %v957_v60 = vld [vmem:[%s1515_s1 + $0x6] ss:$8 sm:$0x3] }
  0xc5   : > { %630 = vmatprep.subr.bf16.mxu0 %v402_v7 }
  0xc6   : > { %631 = vmatpush1.bf16.msra.mxu0 %v401_v8 }
  0xc7   : > { %v412_v11 = vpop.permute.xlu1 %411  ;;  %v410_v15 = vpop.permute.xlu0 %409 }
  0xc8   : > { %v415_v16 = vsel %vm413_vm4, %v408_v5, %v412_v11  ;;  %v417_v17 = vsel %vm413_vm4, %v412_v11, %v408_v5  ;;  %v414_v18 = vsel %vm413_vm4, %v406_v6, %v410_v15  ;;  %v416_v19 = vsel %vm413_vm4, %v410_v15, %v406_v6 }
  0xc9   : > { %v433_v20 = vmul.f32 %v424_v9, %v417_v17  ;;  %v434_v21 = vmul.f32 %v428_v10, %v415_v16  ;;  %v431_v22 = vmul.f32 %v424_v9, %v416_v19  ;;  %v432_v23 = vmul.f32 %v428_v10, %v414_v18 }
  0xca   : > { %v530_v5 = vrot.slane %v957_v60, %v1381_v13  ;;  %v534_v6 = vrot.slane %v957_v60, %v1383_v14 }
  0xcb   : > { %v446_v25 = vpop.permute.xlu1 %445  ;;  %v444_v26 = vpop.permute.xlu0 %443  ;;  %v436_v27 = vpack.c.bf16 %v434_v21, %v432_v23  ;;  %v435_v28 = vpack.c.bf16 %v433_v20, %v431_v22  ;;  %v958_v20 = vld [vmem:[%s1515_s1 + $0x7] ss:$8 sm:$0x3] }
  0xcd   : > { %632 = vmatprep.subr.bf16.mxu0 %v436_v27 }
  0xce   : > { %633 = vmatpush1.bf16.msra.mxu0 %v435_v28 }
  0xcf   : > { %v450_v33 = vpop.permute.xlu1 %449  ;;  %v448_v34 = vpop.permute.xlu0 %447  ;;  %634 = vmatprep.subr.bf16.mxu0 %v440_v29 }
  0xd0   : > { %v453_v35 = vsel %vm451_vm5, %v446_v25, %v450_v33  ;;  %v455_v36 = vsel %vm451_vm5, %v450_v33, %v446_v25  ;;  %v452_v37 = vsel %vm451_vm5, %v444_v26, %v448_v34  ;;  %v454_v38 = vsel %vm451_vm5, %v448_v34, %v444_v26 }
  0xd1   : > { %v471_v39 = vmul.f32 %v462_v30, %v453_v35  ;;  %v472_v40 = vmul.f32 %v466_v31, %v455_v36  ;;  %v469_v41 = vmul.f32 %v462_v30, %v452_v37  ;;  %v470_v42 = vmul.f32 %v466_v31, %v454_v38 }
  0xd2   : > { %635 = vmatpush1.bf16.msra.mxu0 %v439_v32  ;;  %v564_v25 = vrot.slane %v958_v20, %v1381_v13  ;;  %v568_v26 = vrot.slane %v958_v20, %v1383_v14  ;;  %v1037_v13 = vld [vmem:[%s1516_s2 + $0x14] ss:$8 sps:$4 sm:$0xff]   ;;  %v1039_v14 = vld [vmem:[%s1516_s2 + $0x10] ss:$8 sps:$4 sm:$0xff]  }
  0xd3   : > { %v480_v44 = vpop.permute.xlu1 %479  ;;  %v478_v45 = vpop.permute.xlu0 %477  ;;  %v474_v46 = vpack.c.bf16 %v472_v40, %v470_v42  ;;  %v473_v47 = vpack.c.bf16 %v471_v39, %v469_v41 }
  0xd5   : > { %636 = vmatprep.subr.bf16.mxu0 %v474_v46 }
  0xd6   : > { %637 = vmatpush1.bf16.msra.mxu0 %v473_v47 }
  0xd7   : > { %v484_v50 = vpop.permute.xlu1 %483  ;;  %v482_v51 = vpop.permute.xlu0 %481 }
  0xd8   : > { %v487_v52 = vsel %vm485_vm6, %v480_v44, %v484_v50  ;;  %v489_v53 = vsel %vm485_vm6, %v484_v50, %v480_v44  ;;  %v486_v54 = vsel %vm485_vm6, %v478_v45, %v482_v51  ;;  %v488_v55 = vsel %vm485_vm6, %v482_v51, %v478_v45 }
  0xd9   : > { %v505_v56 = vmul.f32 %v496_v48, %v487_v52  ;;  %v506_v57 = vmul.f32 %v500_v49, %v489_v53  ;;  %v503_v58 = vmul.f32 %v496_v48, %v486_v54  ;;  %v504_v59 = vmul.f32 %v500_v49, %v488_v55 }
  0xdb   : > { %v514_v61 = vpop.permute.xlu1 %513  ;;  %v512_v62 = vpop.permute.xlu0 %511  ;;  %v508_v63 = vpack.c.bf16 %v506_v57, %v504_v59  ;;  %v507_v4 = vpack.c.bf16 %v505_v56, %v503_v58 }
  0xdd   : > { %638 = vmatprep.subr.bf16.mxu0 %v508_v63 }
  0xde   : > { %639 = vmatpush1.bf16.msra.mxu0 %v507_v4 }
  0xdf   : > { %v518_v7 = vpop.permute.xlu1 %517  ;;  %v516_v8 = vpop.permute.xlu0 %515 }
  0xe0   : > { %v521_v9 = vsel %vm519_vm7, %v514_v61, %v518_v7  ;;  %v523_v10 = vsel %vm519_vm7, %v518_v7, %v514_v61  ;;  %v520_v11 = vsel %vm519_vm7, %v512_v62, %v516_v8  ;;  %v522_v15 = vsel %vm519_vm7, %v516_v8, %v512_v62 }
  0xe1   : > { %v539_v16 = vmul.f32 %v530_v5, %v521_v9  ;;  %v540_v17 = vmul.f32 %v534_v6, %v523_v10  ;;  %v537_v18 = vmul.f32 %v530_v5, %v520_v11  ;;  %v538_v19 = vmul.f32 %v534_v6, %v522_v15 }
  0xe3   : > { %v548_v21 = vpop.permute.xlu1 %547  ;;  %v546_v22 = vpop.permute.xlu0 %545  ;;  %v542_v23 = vpack.c.bf16 %v540_v17, %v538_v19  ;;  %v541_v24 = vpack.c.bf16 %v539_v16, %v537_v18 }
  0xe5   : > { %640 = vmatprep.subr.bf16.mxu0 %v542_v23 }
  0xe6   : > { %641 = vmatpush1.bf16.msra.mxu0 %v541_v24 }
  0xe7   : > { %v552_v27 = vpop.permute.xlu1 %551  ;;  %v550_v28 = vpop.permute.xlu0 %549 }
  0xe8   : > { %v555_v29 = vsel %vm553_vm8, %v548_v21, %v552_v27  ;;  %v557_v30 = vsel %vm553_vm8, %v552_v27, %v548_v21  ;;  %v554_v31 = vsel %vm553_vm8, %v546_v22, %v550_v28  ;;  %v556_v32 = vsel %vm553_vm8, %v550_v28, %v546_v22 }
  0xe9   : > { %v573_v33 = vmul.f32 %v564_v25, %v555_v29  ;;  %v574_v34 = vmul.f32 %v568_v26, %v557_v30  ;;  %v571_v35 = vmul.f32 %v564_v25, %v554_v31  ;;  %v572_v36 = vmul.f32 %v568_v26, %v556_v32 }
  0xeb   : > { %v576_v37 = vpack.c.bf16 %v574_v34, %v572_v36  ;;  %v575_v38 = vpack.c.bf16 %v573_v33, %v571_v35  ;;  %v782_v34 = vld [vmem:[%s1520_s6 + $0x8] sm:$0xff]  ;;  %v781_v35 = vld [vmem:[%s1520_s6] sm:$0xff] }
  0xed   : > { %642 = vmatprep.subr.bf16.mxu0 %v576_v37 }
  0xee   : > { %643 = vmatpush1.bf16.msra.mxu0 %v575_v38 }
  0xf1   : > { %659 = vmatmul.mubr.bf16.vlgmr.msra.gmra.mrb[0].mxu0 %v1034_v12 }
  0xf2   : > { %964 = vmatprep.mubr.msk.bf16.mxu0 %vm619_vm0, %v1037_v13 }
  0xf8   : > { %v700_v43 = vpop.permute.xlu0 %699  ;;  %v705_v47 = vpop.permute.xlu1 %704 }
  0xf9   : > { %669 = vmatmul.mubr.bf16.gmra.mrb[4].mxu0 %v1039_v14 }
  0xfc   : > { %v684_v58 = vpop.permute.xlu1 %683  ;;  %v689_v63 = vpop.permute.xlu0 %688 }
 0x1c4   : > { %v660_v39 = vpop.f32.mrb[0].mxu0 }
 0x1c5   : > { %v662_v40 = vpop.f32.mrb[1].mxu0  ;;  %v691_v7 = vadd.f32 %v684_v58, %v660_v39 }
 0x1c6   : > { %v664_v41 = vpop.f32.mrb[2].mxu0  ;;  %v692_v11 = vadd.f32 %v684_v58, %v662_v40 }
 0x1c7   : > { %v666_v42 = vpop.f32.mrb[3].mxu0  ;;  %v693_v18 = vadd.f32 %v689_v63, %v664_v41 }
 0x1c8   : > { %v694_v21 = vadd.f32 %v689_v63, %v666_v42 }
 0x1cc   : > { %v670_v44 = vpop.f32.mrb[4].mxu0 }
 0x1cd   : > { %v707_v45 = vadd.f32 %v700_v43, %v670_v44  ;;  %v672_v46 = vpop.f32.mrb[5].mxu0 }
 0x1ce   : > { %v708_v48 = vadd.f32 %v700_v43, %v672_v46  ;;  %v674_v49 = vpop.f32.mrb[6].mxu0 }
 0x1cf   : > { %v715_v50 = vmul.f32 0.70710677, %v707_v45  ;;  %v709_v51 = vadd.f32 %v705_v47, %v674_v49  ;;  %v676_v52 = vpop.f32.mrb[7].mxu0  ;;  %v711_v60 = vmul.f32 0.5, %v707_v45 }
 0x1d0   : > { %v716_v53 = vmul.f32 0.70710677, %v708_v48  ;;  %v710_v54 = vadd.f32 %v705_v47, %v676_v52  ;;  %v712_v4 = vmul.f32 0.5, %v708_v48 }
 0x1d1   : > { %1041 = verf.f32 %v715_v50  ;;  %v717_v55 = vmul.f32 0.70710677, %v709_v51  ;;  %v713_v9 = vmul.f32 0.5, %v709_v51 }
 0x1d2   : > { %1043 = verf.f32 %v716_v53  ;;  %v718_v56 = vmul.f32 0.70710677, %v710_v54  ;;  %v714_v16 = vmul.f32 0.5, %v710_v54 }
 0x1d3   : > { %1045 = verf.f32 %v717_v55 }
 0x1d4   : > { %1047 = verf.f32 %v718_v56 }
 0x1db   : > { %v1042_v57 = vpop.eup %1041 }
 0x1dc   : > { %v1044_v59 = vpop.eup %1043  ;;  %v723_v61 = vadd.f32 1.0, %v1042_v57 }
 0x1dd   : > { %v1046_v62 = vpop.eup %1045  ;;  %v724_v5 = vadd.f32 1.0, %v1044_v59 }
 0x1de   : > { %v1048_v6 = vpop.eup %1047  ;;  %v727_v8 = vmul.f32 %v723_v61, %v711_v60  ;;  %v725_v10 = vadd.f32 1.0, %v1046_v62  ;;  %v1040_v61 = vld [vmem:[%s1519_s5] sm:$0xff]  }
 0x1df   : > { %v728_v15 = vmul.f32 %v724_v5, %v712_v4  ;;  %v726_v17 = vadd.f32 1.0, %v1048_v6 }
 0x1e0   : > { %v729_v19 = vmul.f32 %v725_v10, %v713_v9  ;;  %v731_v20 = vmul.f32 %v727_v8, %v691_v7 }
 0x1e1   : > { %v730_v22 = vmul.f32 %v726_v17, %v714_v16  ;;  %v732_v23 = vmul.f32 %v728_v15, %v692_v11 }
 0x1e2   : > { %v733_v24 = vmul.f32 %v729_v19, %v693_v18  ;;  %v743_v30 = vmul.f32 %v731_v20, %v731_v20 }
 0x1e3   : > { %v735_v25 = vadd.f32 %v732_v23, %v731_v20  ;;  %v734_v26 = vmul.f32 %v730_v22, %v694_v21  ;;  %v744_v31 = vmul.f32 %v732_v23, %v732_v23 }
 0x1e4   : > { %v745_v27 = vmul.f32 %v733_v24, %v733_v24 }
 0x1e5   : > { %736 = vadd.xlane.f32.xlu1 %v735_v25  ;;  %v738_v28 = vadd.f32 %v734_v26, %v733_v24  ;;  %v746_v29 = vmul.f32 %v734_v26, %v734_v26  ;;  %v747_v33 = vadd.f32 %v744_v31, %v743_v30 }
 0x1e7   : > { %739 = vadd.xlane.f32.xlu0 %v738_v28  ;;  %v750_v32 = vadd.f32 %v746_v29, %v745_v27 }
 0x1e9   : > { %751 = vadd.xlane.f32.xlu1 %v750_v32 }
 0x1eb   : > { %748 = vadd.xlane.f32.xlu0 %v747_v33 }
 0x1fa   : > { %790 = vperm.xlu1 %1033, %v782_v34  }
 0x201   : > { %785 = vperm.xlu0 %1032, %v781_v35  }
 0x272   : > { %v737_v36 = vpop.xlane.xlu1 %736 }
 0x273   : > { %v741_v38 = vmul.f32 0.00390625, %v737_v36 }
 0x274   : > { %v740_v37 = vpop.xlane.xlu0 %739 }
 0x275   : > { %v742_v12 = vmul.f32 0.00390625, %v740_v37  ;;  %v755_v42 = vmul.f32 %v741_v38, %v741_v38  ;;  %v761_v50 = vsub.f32 %v731_v20, %v741_v38  ;;  %v762_v52 = vsub.f32 %v732_v23, %v741_v38 }
 0x276   : > { %v752_v13 = vpop.xlane.xlu1 %751 }
 0x277   : > { %v754_v14 = vmul.f32 0.00390625, %v752_v13  ;;  %v756_v39 = vmul.f32 %v742_v12, %v742_v12  ;;  %v763_v51 = vsub.f32 %v733_v24, %v742_v12  ;;  %v764_v53 = vsub.f32 %v734_v26, %v742_v12 }
 0x278   : > { %v749_v40 = vpop.xlane.xlu0 %748 }
 0x279   : > { %v758_v41 = vsub.f32 %v754_v14, %v756_v39  ;;  %v753_v43 = vmul.f32 0.00390625, %v749_v40 }
 0x27a   : > { %v791_v6 = vpop.permute.xlu1 %790 }
 0x27b   : > { %v760_v44 = vmax.f32 %v758_v41, 0.0  ;;  %v757_v45 = vsub.f32 %v753_v43, %v755_v42 }
 0x27d   : > { %v766_v46 = vadd.f32 1e-05, %v760_v44  ;;  %v759_v47 = vmax.f32 %v757_v45, 0.0 }
 0x27f   : > { %1049 = vrsqrt.f32 %v766_v46  ;;  %v765_v48 = vadd.f32 1e-05, %v759_v47 }
 0x280   : > { %v786_v62 = vpop.permute.xlu0 %785 }
 0x281   : > { %1051 = vrsqrt.f32 %v765_v48 }
 0x289   : > { %v1050_v49 = vpop.eup %1049 }
 0x28a   : > { %v772_v56 = vmul.f32 %v1050_v49, %v764_v53  ;;  %v771_v58 = vmul.f32 %v1050_v49, %v763_v51 }
 0x28b   : > { %v1052_v54 = vpop.eup %1051 }
 0x28c   : > { %v770_v55 = vmul.f32 %v1052_v54, %v762_v52  ;;  %v769_v57 = vmul.f32 %v1052_v54, %v761_v50 }
 0x28e   : > { %v774_v59 = vpack.c.bf16 %v772_v56, %v770_v55  ;;  %v773_v60 = vpack.c.bf16 %v771_v58, %v769_v57 }
 0x290   : > { %801 = vmatprep.subr.bf16.mxu1 %v774_v59 }
 0x291   : > { %802 = vmatpush1.bf16.msra.mxu1 %v773_v60 }
 0x294   : > { %966 = vmatmul.mubr.msk.bf16.vlgmr.msra.gmra.mrb[0].mxu1 %vm619_vm0, %v1040_v61 }
 0x367   : > { %v835_v63 = vpop.f32.mrb[0].mxu1 }
 0x368   : > { %v836_v4 = vadd.f32 %v835_v63, %v786_v62  ;;  %v837_v5 = vpop.f32.mrb[1].mxu1 }
 0x369   : > { %v838_v7 = vadd.f32 %v837_v5, %v786_v62  ;;  %v839_v8 = vpop.f32.mrb[2].mxu1 }
 0x36a   : > { %v848_v9 = vadd.f32 %v836_v4, %v1321_v1  ;;  %v840_v10 = vadd.f32 %v839_v8, %v791_v6  ;;  %v841_v11 = vpop.f32.mrb[3].mxu1 }
 0x36b   : > { %v849_v15 = vadd.f32 %v838_v7, %v1319_v0  ;;  %v842_v16 = vadd.f32 %v841_v11, %v791_v6 }
 0x36c   : > { %852 = vst [vmem:[%s296_s12] sm:$0xff] %v848_v9  ;;  %v850_v17 = vadd.f32 %v840_v10, %v1327_v3 }
 0x36d   : > { %853 = vst [vmem:[%s296_s12 + $0x8] sm:$0xff] %v849_v15  ;;  %v851_v18 = vadd.f32 %v842_v16, %v1325_v2 }
 0x36e   : > { %854 = vst [vmem:[%s296_s12 + $0x10] sm:$0xff] %v850_v17 }
 0x36f   : > { %855 = vst [vmem:[%s296_s12 + $0x18] sm:$0xff] %v851_v18 }
 0x370   : > { %1096 = shalt.err (!%p1093_p2)
}
 0x371   : > { %s1097_s15 = scalar_lea.hbm %s1469_s21, 512  ;;  %s1101_s29 = scalar_lea.hbm %s1521_s7, 1024 }
 0x372   : > { %p1098_p4 = scmp.ne.s32.totalorder %s1469_s21, %s1097_s15  ;;  %p1102_p9 = scmp.lt.u32.totalorder %s1469_s21, %s1521_s7 }
 0x373   : > { %p1103_p1 = scmp.lt.u32.totalorder %s1101_s29, %s1097_s15  ;;  %p1105_p6 = scmp.lt.u32.totalorder %s1097_s15, %s1469_s21 }
 0x374   : > { %p1099_p5 = pnand %p1098_p4, %p1528_p11 }
 0x375   : > { %p1104_p3 = por %p1103_p1, %p1102_p9 }
 0x376   : > { %p1100_p7 = pneg %p1099_p5 }
 0x377   : > { %p1106_p12 = por %p1105_p6, %p1104_p3 }
 0x379   : > { %p1107_p13 = pnand %p1106_p12, %p1100_p7 }
 0x37b   : > { %1110 = shalt.err (!%p1107_p13)
}
 0x37c   : > { %s1164_s9 = smov 256  }
 0x37d   : > { %976 = dma.vmem_to_hbm [thread:$0]  (%p1528_p11), %s1462_s23, 512, %s1469_s21, %s857_s28, %s1164_s9, %s1164_s9, %s1155_s22  }
 0x37e PF: > { %s885_s8 = sand.u32 1, %s1137_s24   ;;  %p1529_p8 = scmp.ne.s32.totalorder %s1526_s14, 0 }
 0x37f   : > { %p1530_p10 = scmp.ge.s32.totalorder %s1149_s27, 2  ;;  %s886_s11 = scalar_lea.sflag [#allocation6], %s885_s8 }
 0x381   : > { %p983_p0 = pnand %p1530_p10, %p1529_p8 }
 0x383   : > { %1132 = dma.done.wait (!%p983_p0), %s886_s11, 512  }
 0x384   : > { %1134 = vsyncadd (!%p983_p0), %s886_s11, 4294966784  ;;  %p20_p2 = scmp.ge.s32.totalorder %s1230_s30, 4   ;;  %s1531_s24 = smov %s1141_s25 }
 0x385   : > { %s1532_s25 = smov %s1145_s26  ;;  %s1533_s26 = smov %s1242_s10 }
 0x386   : > { %s1534_s27 = smov %s1230_s30  ;;  %22 = sbr.rel (!%p20_p2) target bundleno = 5 (0x5), region = 100 }
 0x38d   :  { %891 = vsyncpa [#allocation5], 1 }
 0x38e   :  { %893 = vsyncpa [#allocation5 + $0x1], 1 }
 0x38f   :  { %894 = vsyncpa [#allocation6], 1 }
 0x390   :  { %896 = vsyncpa [#allocation6 + $0x1], 1 }

</bundles_post_ra>
